<compile_context>
chip_gen: v7x
topology: tpu7x:2x2x1
jax: 0.10.0
libtpu: 0.0.40
codegen_flags: <defaults>
</compile_context>

<pallas_src>
import functools
import math

import jax
import jax.numpy as jnp
from jax.experimental import pallas as pl
from jax.experimental.pallas import tpu as pltpu


def _round_up(a, m):
    return (a + m - 1) // m * m


def _full_attention_kernel(x_ref, wq_ref, wkT_ref, wv_ref,
                           bq_ref, bk_ref, bv_ref, o_ref,
                           q_ref, kT_ref, v_ref, *,
                           n_heads, d_keys, seq_len):
    H, E = n_heads, d_keys
    HE = H * E
    L_pad = v_ref.shape[0]
    TQ = o_ref.shape[1]
    qt = pl.program_id(1)

    # ---- K / V projection, once per batch element (first query tile).
    #      K is produced directly in transposed (HE, L) layout so the per-tile
    #      score matmuls below are plain (TQ,E)@(E,L) MXU passes; the single
    #      operand reorientation happens here, once per batch element, instead
    #      of per head per query tile.
    @pl.when(qt == 0)
    def _():
        x_full = x_ref[0]                                          # (L_pad, D)
        kT = jax.lax.dot_general(
            wkT_ref[...], x_full,
            dimension_numbers=(((1,), (1,)), ((), ())),
            preferred_element_type=jnp.float32) + bk_ref[...]      # (HE, L_pad)
        kT_ref[...] = kT.astype(kT_ref.dtype)
        v = (jnp.dot(x_full, wv_ref[...],
                     preferred_element_type=jnp.float32)
             + bv_ref[...])                                        # (L_pad, HE)
        v_ref[...] = v.astype(v_ref.dtype)

    # ---- Per-tile Q projection (softmax scale already folded into Wq / bq),
    #      stored to a small VMEM scratch so the head loop ref-slices only the
    #      E columns it needs (bounds vreg pressure / vld traffic).
    q_start = pl.multiple_of(qt * TQ, 8)
    x_rows = x_ref[0, pl.ds(q_start, TQ), :]                       # (TQ, D)
    q_ref[...] = (jnp.dot(x_rows, wq_ref[...],
                          preferred_element_type=jnp.float32)
                  + bq_ref[...]).astype(q_ref.dtype)               # (TQ, HE)

    if L_pad > seq_len:  # static: mask padded key columns
        key_valid = jax.lax.broadcasted_iota(jnp.int32, (1, L_pad), 1) < seq_len

    # Static per-head loop; all slice offsets are compile-time constants and
    # the operands come straight from VMEM refs.
    # TODO(synk): for H >= ~8 with E a multiple of 128 lanes, switch to
    #             lax.fori_loop with pl.ds lane offsets to bound live ranges.
    for h in range(H):
        q_h = q_ref[:, h * E:(h + 1) * E]                          # (TQ, E)
        kT_h = kT_ref[h * E:(h + 1) * E, :]                        # (E, L_pad)
        v_h = v_ref[:, h * E:(h + 1) * E]                          # (L_pad, E)

        s = jnp.dot(q_h, kT_h, preferred_element_type=jnp.float32)  # (TQ, L_pad)
        if L_pad > seq_len:
            s = jnp.where(key_valid, s, -1e30)
        s = s - jnp.max(s, axis=-1, keepdims=True)
        p = jnp.exp(s)
        denom = jnp.sum(p, axis=-1, keepdims=True)                 # (TQ, 1) >= 1

        o_h = jnp.dot(p.astype(v_h.dtype), v_h,
                      preferred_element_type=jnp.float32)          # (TQ, E)
        o_h = o_h * pl.reciprocal(denom, approx=True)              # EUP slot
        # TODO(synk): when E < 128, pad the per-head stride to 128 lanes
        #             host-side so this store is lane-dense (vst, not vst.msk).
        o_ref[0, :, h * E:(h + 1) * E] = o_h.astype(o_ref.dtype)


def _default_block_q():
    # v5e's MXU is 128-wide (4x128^2); 256-row tiles only pay on v6e/v7x.
    try:
        kind = jax.devices()[0].device_kind.lower()
        if "v5 lite" in kind or "v5e" in kind or "v5litepod" in kind:
            return 128
    except Exception:
        pass
    return 256


def full_attention(x, wq, bq, wk, bk, wv, bv, *, n_heads, block_q=None):
    """x: (B, L, D); w*: (D, H*E) (already transposed); b*: (H*E,).

    Returns (B, L, H*E) -- heads concatenated on the last dim (eval-mode:
    dropout is identity).
    """
    B, L, D = x.shape
    HE = wq.shape[1]
    d_keys = HE // n_heads
    scale = 1.0 / math.sqrt(d_keys)
    dt = x.dtype
    itemsize = jnp.dtype(dt).itemsize

    if block_q is None:
        block_q = _default_block_q()

    # Host-side prep: fold the softmax scale into the Q projection, keep the
    # K weight in (HE, D) orientation (K^T straight off the MXU), and cast
    # everything to x.dtype (bf16 MXU operands, half the weight DMA / VMEM).
    w_q = (wq * scale).astype(dt)                       # (D, HE)
    w_kT = wk.T.astype(dt)                              # (HE, D)
    w_v = wv.astype(dt)                                 # (D, HE)
    b_q = (bq * scale).reshape(1, HE).astype(dt)        # (1, HE)
    b_k = bk.reshape(HE, 1).astype(dt)                  # (HE, 1)
    b_v = bv.reshape(1, HE).astype(dt)                  # (1, HE)

    # Query-tile size + sequence padding (never a single full-L tile for long L).
    if L <= block_q:
        tq = _round_up(L, 8)
        L_pad = tq
    else:
        tq = block_q
        L_pad = _round_up(L, tq)
    num_q = L_pad // tq

    x_in = x if L_pad == L else jnp.pad(x, ((0, 0), (0, L_pad - L), (0, 0)))

    kernel = functools.partial(_full_attention_kernel,
                               n_heads=n_heads, d_keys=d_keys, seq_len=L)

    # Resident VMEM estimate: x block (double-buffered) + single-buffered
    # weights/biases + output tile (double-buffered) + Q/K^T/V scratches
    # + per-head f32 score/exp temporaries.
    resident = ((2 * L_pad * D
                 + 3 * D * HE + 2 * HE + HE
                 + 2 * tq * HE
                 + tq * HE + 2 * L_pad * HE) * itemsize
                + 6 * tq * L_pad * 4)
    vmem_limit = int(min(100 * 1024 * 1024,
                         max(32 * 1024 * 1024, int(resident * 1.5))))

    flops = 2 * B * L_pad * D * 3 * HE + 4 * B * L_pad * L_pad * HE
    cost = pl.CostEstimate(
        flops=int(flops),
        transcendentals=int(B * n_heads * L_pad * L_pad),
        bytes_accessed=int((int(x_in.size) + int(w_q.size) + int(w_kT.size)
                            + int(w_v.size) + int(b_q.size) + int(b_k.size)
                            + int(b_v.size) + B * L_pad * HE) * itemsize))

    def const_spec(shape):
        # Constant index map -> no point double-buffering; keep VMEM for tiles.
        return pl.BlockSpec(shape, lambda b, q: (0, 0),
                            pipeline_mode=pl.Buffered(1))

    out = pl.pallas_call(
        kernel,
        out_shape=jax.ShapeDtypeStruct((B, L_pad, HE), dt),
        grid_spec=pltpu.PrefetchScalarGridSpec(
            num_scalar_prefetch=0,
            grid=(B, num_q),
            in_specs=[
                # Full (padded) sequence per batch element; block index is
                # constant along the query-tile axis so it stays resident.
                pl.BlockSpec((1, L_pad, D), lambda b, q: (b, 0, 0)),
                const_spec((D, HE)),       # w_q (scale folded)
                const_spec((HE, D)),       # w_k^T
                const_spec((D, HE)),       # w_v
                const_spec((1, HE)),       # b_q (scale folded)
                const_spec((HE, 1)),       # b_k
                const_spec((1, HE)),       # b_v
            ],
            out_specs=pl.BlockSpec((1, tq, HE), lambda b, q: (b, q, 0)),
            scratch_shapes=[
                pltpu.VMEM((tq, HE), dt),      # per-tile Q
                pltpu.VMEM((HE, L_pad), dt),   # K^T (resident per batch elem)
                pltpu.VMEM((L_pad, HE), dt),   # V   (resident per batch elem)
            ],
        ),
        compiler_params=pltpu.CompilerParams(
            # Batch axis may shard across TensorCores; the query-tile axis
            # carries the K^T/V scratch so it must stay on one core.
            dimension_semantics=("parallel", "arbitrary"),
            vmem_limit_bytes=vmem_limit),
        cost_estimate=cost,
    )(x_in, w_q, w_kT, w_v, b_q, b_k, b_v)

    return out if L_pad == L else out[:, :L, :]


def _reference(x, wq, bq, wk, bk, wv, bv, n_heads):
    B, L, D = x.shape
    HE = wq.shape[1]
    E = HE // n_heads
    q = (x @ wq + bq).reshape(B, L, n_heads, E)
    k = (x @ wk + bk).reshape(B, L, n_heads, E)
    v = (x @ wv + bv).reshape(B, L, n_heads, E)
    scores = jnp.einsum('blhe,bshe->bhls', q, k) / math.sqrt(E)
    A = jax.nn.softmax(scores, axis=-1)
    out = jnp.einsum('bhls,bshe->blhe', A, v)
    return out.reshape(B, L, HE)


if __name__ == "__main__":
    # Small shapes consistent with the module's forward.
    B, L, d_model, n_heads = 2, 8, 32, 4
    d_keys = d_model // n_heads          # 8
    HE = d_keys * n_heads                # 32

    key = jax.random.PRNGKey(0)
    kx, k1, k2, k3, k4, k5, k6 = jax.random.split(key, 7)

    x = jax.random.normal(kx, (B, L, d_model), dtype=jnp.float32)

    # Deterministic parameter init (PyTorch Linear weight is (out, in);
    # we store the transpose (in, out) so the wrapper computes x @ W + b).
    bound = 1.0 / math.sqrt(d_model)
    wq = jax.random.uniform(k1, (d_model, HE), jnp.float32, -bound, bound)
    wk = jax.random.uniform(k2, (d_model, HE), jnp.float32, -bound, bound)
    wv = jax.random.uniform(k3, (d_model, HE), jnp.float32, -bound, bound)
    bq = jax.random.uniform(k4, (HE,), jnp.float32, -bound, bound)
    bk = jax.random.uniform(k5, (HE,), jnp.float32, -bound, bound)
    bv = jax.random.uniform(k6, (HE,), jnp.float32, -bound, bound)

    out = full_attention(x, wq, bq, wk, bk, wv, bv, n_heads=n_heads)
    out = jax.block_until_ready(out)

    ref = _reference(x, wq, bq, wk, bk, wv, bv, n_heads)
    assert out.shape == (B, L, HE)
    # approx reciprocal (EUP) -> slightly relaxed tolerance vs exact f32 ref.
    assert jnp.allclose(out, ref, atol=5e-3, rtol=5e-3), "mismatch vs reference"

    print("KERNEL_OK")
</pallas_src>

<mosaic_0001>
module attributes {stable_mosaic.version = 11 : i64} {
  func.func @_full_attention_kernel(%arg0: i32, %arg1: i32, %arg2: memref<1x8x32xf32, #tpu.memory_space<vmem>>, %arg3: memref<32x32xf32, #tpu.memory_space<vmem>>, %arg4: memref<32x32xf32, #tpu.memory_space<vmem>>, %arg5: memref<32x32xf32, #tpu.memory_space<vmem>>, %arg6: memref<1x32xf32, #tpu.memory_space<vmem>>, %arg7: memref<32x1xf32, #tpu.memory_space<vmem>>, %arg8: memref<1x32xf32, #tpu.memory_space<vmem>>, %arg9: memref<1x8x32xf32, #tpu.memory_space<vmem>>, %arg10: memref<8x32xf32, #tpu.memory_space<vmem>>, %arg11: memref<32x8xf32, #tpu.memory_space<vmem>>, %arg12: memref<8x32xf32, #tpu.memory_space<vmem>>) attributes {dimension_semantics = [#tpu.dimension_semantics<parallel>, #tpu.dimension_semantics<arbitrary>], iteration_bounds = array<i64: 2, 1>, scalar_prefetch = 0 : i64, scratch_operands = 3 : i64, tpu.core_type = #tpu.core_type<tc>, window_params = [{transform_indices = @transform_0, window_bounds = array<i64: 1, 8, 32>}, {pipeline_mode = #tpu.pipeline_mode<synchronous>, transform_indices = @transform_1, window_bounds = array<i64: 32, 32>}, {pipeline_mode = #tpu.pipeline_mode<synchronous>, transform_indices = @transform_2, window_bounds = array<i64: 32, 32>}, {pipeline_mode = #tpu.pipeline_mode<synchronous>, transform_indices = @transform_3, window_bounds = array<i64: 32, 32>}, {pipeline_mode = #tpu.pipeline_mode<synchronous>, transform_indices = @transform_4, window_bounds = array<i64: 1, 32>}, {pipeline_mode = #tpu.pipeline_mode<synchronous>, transform_indices = @transform_5, window_bounds = array<i64: 32, 1>}, {pipeline_mode = #tpu.pipeline_mode<synchronous>, transform_indices = @transform_6, window_bounds = array<i64: 1, 32>}, {transform_indices = @transform_7, window_bounds = array<i64: 1, 8, 32>}]} {
    %c0_i32 = arith.constant 0 : i32
    %0 = arith.cmpi eq, %arg1, %c0_i32 : i32
    %1 = arith.extui %0 : i1 to i32
    %c0_i32_0 = arith.constant 0 : i32
    %2 = arith.cmpi ne, %1, %c0_i32_0 : i32
    scf.if %2 {
      %c0_57 = arith.constant 0 : index
      %c0_58 = arith.constant 0 : index
      %c0_59 = arith.constant 0 : index
      %86 = vector.load %arg2[%c0_57, %c0_58, %c0_59] : memref<1x8x32xf32, #tpu.memory_space<vmem>>, vector<1x8x32xf32>
      %87 = vector.shape_cast %86 : vector<1x8x32xf32> to vector<8x32xf32>
      %c0_60 = arith.constant 0 : index
      %c0_61 = arith.constant 0 : index
      %88 = vector.load %arg4[%c0_60, %c0_61] : memref<32x32xf32, #tpu.memory_space<vmem>>, vector<32x32xf32>
      %cst_62 = arith.constant dense<0.000000e+00> : vector<32x8xf32>
      %89 = tpu.matmul %88, %87, %cst_62 {dimension_numbers = #tpu.dot_dimension_numbers<[1], [1], [0], [0], [0, 0, 1, 0], [], []>} : vector<32x32xf32>, vector<8x32xf32>, vector<32x8xf32> -> vector<32x8xf32>
      %c0_63 = arith.constant 0 : index
      %c0_64 = arith.constant 0 : index
      %90 = vector.load %arg7[%c0_63, %c0_64] : memref<32x1xf32, #tpu.memory_space<vmem>>, vector<32x1xf32>
      %91 = vector.broadcast %90 : vector<32x1xf32> to vector<32x8xf32>
      %92 = arith.addf %89, %91 : vector<32x8xf32>
      %c0_65 = arith.constant 0 : index
      %c0_66 = arith.constant 0 : index
      %93 = vector.load %arg11[%c0_65, %c0_66] : memref<32x8xf32, #tpu.memory_space<vmem>>, vector<32x8xf32>
      tpu.vector_store %arg11[%c0_65, %c0_66], %92 {strides = array<i32>} : memref<32x8xf32, #tpu.memory_space<vmem>>, vector<32x8xf32>,
      %c0_67 = arith.constant 0 : index
      %c0_68 = arith.constant 0 : index
      %94 = vector.load %arg5[%c0_67, %c0_68] : memref<32x32xf32, #tpu.memory_space<vmem>>, vector<32x32xf32>
      %cst_69 = arith.constant dense<0.000000e+00> : vector<8x32xf32>
      %95 = tpu.matmul %87, %94, %cst_69 {dimension_numbers = #tpu.dot_dimension_numbers<[1], [0], [0], [1], [0, 0, 1, 1], [], []>} : vector<8x32xf32>, vector<32x32xf32>, vector<8x32xf32> -> vector<8x32xf32>
      %c0_70 = arith.constant 0 : index
      %c0_71 = arith.constant 0 : index
      %96 = vector.load %arg8[%c0_70, %c0_71] : memref<1x32xf32, #tpu.memory_space<vmem>>, vector<1x32xf32>
      %97 = vector.broadcast %96 : vector<1x32xf32> to vector<8x32xf32>
      %98 = arith.addf %95, %97 : vector<8x32xf32>
      %c0_72 = arith.constant 0 : index
      %c0_73 = arith.constant 0 : index
      %99 = vector.load %arg12[%c0_72, %c0_73] : memref<8x32xf32, #tpu.memory_space<vmem>>, vector<8x32xf32>
      tpu.vector_store %arg12[%c0_72, %c0_73], %98 {strides = array<i32>} : memref<8x32xf32, #tpu.memory_space<vmem>>, vector<8x32xf32>,
    } else {
    }
    %c8_i32 = arith.constant 8 : i32
    %3 = arith.muli %arg1, %c8_i32 : i32
    %4 = tpu.assume_multiple %3, 8 : i32
    %c0 = arith.constant 0 : index
    %5 = arith.index_cast %4 : i32 to index
    %c0_1 = arith.constant 0 : index
    %6 = vector.load %arg2[%c0, %5, %c0_1] : memref<1x8x32xf32, #tpu.memory_space<vmem>>, vector<1x8x32xf32>
    %7 = vector.shape_cast %6 : vector<1x8x32xf32> to vector<8x32xf32>
    %c0_2 = arith.constant 0 : index
    %c0_3 = arith.constant 0 : index
    %8 = vector.load %arg3[%c0_2, %c0_3] : memref<32x32xf32, #tpu.memory_space<vmem>>, vector<32x32xf32>
    %cst = arith.constant dense<0.000000e+00> : vector<8x32xf32>
    %9 = tpu.matmul %7, %8, %cst {dimension_numbers = #tpu.dot_dimension_numbers<[1], [0], [0], [1], [0, 0, 1, 1], [], []>} : vector<8x32xf32>, vector<32x32xf32>, vector<8x32xf32> -> vector<8x32xf32>
    %c0_4 = arith.constant 0 : index
    %c0_5 = arith.constant 0 : index
    %10 = vector.load %arg6[%c0_4, %c0_5] : memref<1x32xf32, #tpu.memory_space<vmem>>, vector<1x32xf32>
    %11 = vector.broadcast %10 : vector<1x32xf32> to vector<8x32xf32>
    %12 = arith.addf %9, %11 : vector<8x32xf32>
    %c0_6 = arith.constant 0 : index
    %c0_7 = arith.constant 0 : index
    %13 = vector.load %arg10[%c0_6, %c0_7] : memref<8x32xf32, #tpu.memory_space<vmem>>, vector<8x32xf32>
    tpu.vector_store %arg10[%c0_6, %c0_7], %12 {strides = array<i32>} : memref<8x32xf32, #tpu.memory_space<vmem>>, vector<8x32xf32>,
    %c0_8 = arith.constant 0 : index
    %c0_9 = arith.constant 0 : index
    %14 = vector.load %arg10[%c0_8, %c0_9] : memref<8x32xf32, #tpu.memory_space<vmem>>, vector<8x8xf32>
    %c0_10 = arith.constant 0 : index
    %c0_11 = arith.constant 0 : index
    %15 = vector.load %arg11[%c0_10, %c0_11] : memref<32x8xf32, #tpu.memory_space<vmem>>, vector<8x8xf32>
    %c0_12 = arith.constant 0 : index
    %c0_13 = arith.constant 0 : index
    %16 = vector.load %arg12[%c0_12, %c0_13] : memref<8x32xf32, #tpu.memory_space<vmem>>, vector<8x8xf32>
    %cst_14 = arith.constant dense<0.000000e+00> : vector<8x8xf32>
    %17 = tpu.matmul %14, %15, %cst_14 {dimension_numbers = #tpu.dot_dimension_numbers<[1], [0], [0], [1], [0, 0, 1, 1], [], []>} : vector<8x8xf32>, vector<8x8xf32>, vector<8x8xf32> -> vector<8x8xf32>
    %cst_15 = arith.constant dense<0xFF800000> : vector<8xf32>
    %18 = vector.multi_reduction <maximumf>, %17, %cst_15 [1] : vector<8x8xf32> to vector<8xf32>
    %19 = vector.shape_cast %18 : vector<8xf32> to vector<8x1xf32>
    %20 = vector.broadcast %19 : vector<8x1xf32> to vector<8x8xf32>
    %21 = arith.subf %17, %20 : vector<8x8xf32>
    %22 = math.exp %21 : vector<8x8xf32>
    %cst_16 = arith.constant dense<0.000000e+00> : vector<8xf32>
    %23 = vector.multi_reduction <add>, %22, %cst_16 [1] : vector<8x8xf32> to vector<8xf32>
    %24 = vector.shape_cast %23 : vector<8xf32> to vector<8x1xf32>
    %cst_17 = arith.constant dense<0.000000e+00> : vector<8x8xf32>
    %25 = tpu.matmul %22, %16, %cst_17 {dimension_numbers = #tpu.dot_dimension_numbers<[1], [0], [0], [1], [0, 0, 1, 1], [], []>} : vector<8x8xf32>, vector<8x8xf32>, vector<8x8xf32> -> vector<8x8xf32>
    %26 = tpu.reciprocal %24 {approx = true} : vector<8x1xf32> -> vector<8x1xf32>
    %27 = vector.broadcast %26 : vector<8x1xf32> to vector<8x8xf32>
    %28 = arith.mulf %25, %27 : vector<8x8xf32>
    %c0_18 = arith.constant 0 : index
    %c0_19 = arith.constant 0 : index
    %c0_20 = arith.constant 0 : index
    %29 = vector.load %arg9[%c0_18, %c0_19, %c0_20] : memref<1x8x32xf32, #tpu.memory_space<vmem>>, vector<1x8x8xf32>
    %30 = vector.shape_cast %29 : vector<1x8x8xf32> to vector<8x8xf32>
    %31 = vector.shape_cast %28 : vector<8x8xf32> to vector<1x8x8xf32>
    tpu.vector_store %arg9[%c0_18, %c0_19, %c0_20], %31 {strides = array<i32>} : memref<1x8x32xf32, #tpu.memory_space<vmem>>, vector<1x8x8xf32>,
    %c0_21 = arith.constant 0 : index
    %c8 = arith.constant 8 : index
    %32 = vector.load %arg10[%c0_21, %c8] : memref<8x32xf32, #tpu.memory_space<vmem>>, vector<8x8xf32>
    %c8_22 = arith.constant 8 : index
    %c0_23 = arith.constant 0 : index
    %33 = vector.load %arg11[%c8_22, %c0_23] : memref<32x8xf32, #tpu.memory_space<vmem>>, vector<8x8xf32>
    %c0_24 = arith.constant 0 : index
    %c8_25 = arith.constant 8 : index
    %34 = vector.load %arg12[%c0_24, %c8_25] : memref<8x32xf32, #tpu.memory_space<vmem>>, vector<8x8xf32>
    %cst_26 = arith.constant dense<0.000000e+00> : vector<8x8xf32>
    %35 = tpu.matmul %32, %33, %cst_26 {dimension_numbers = #tpu.dot_dimension_numbers<[1], [0], [0], [1], [0, 0, 1, 1], [], []>} : vector<8x8xf32>, vector<8x8xf32>, vector<8x8xf32> -> vector<8x8xf32>
    %cst_27 = arith.constant dense<0xFF800000> : vector<8xf32>
    %36 = vector.multi_reduction <maximumf>, %35, %cst_27 [1] : vector<8x8xf32> to vector<8xf32>
    %37 = vector.shape_cast %36 : vector<8xf32> to vector<8x1xf32>
    %38 = vector.broadcast %37 : vector<8x1xf32> to vector<8x8xf32>
    %39 = arith.subf %35, %38 : vector<8x8xf32>
    %40 = math.exp %39 : vector<8x8xf32>
    %cst_28 = arith.constant dense<0.000000e+00> : vector<8xf32>
    %41 = vector.multi_reduction <add>, %40, %cst_28 [1] : vector<8x8xf32> to vector<8xf32>
    %42 = vector.shape_cast %41 : vector<8xf32> to vector<8x1xf32>
    %cst_29 = arith.constant dense<0.000000e+00> : vector<8x8xf32>
    %43 = tpu.matmul %40, %34, %cst_29 {dimension_numbers = #tpu.dot_dimension_numbers<[1], [0], [0], [1], [0, 0, 1, 1], [], []>} : vector<8x8xf32>, vector<8x8xf32>, vector<8x8xf32> -> vector<8x8xf32>
    %44 = tpu.reciprocal %42 {approx = true} : vector<8x1xf32> -> vector<8x1xf32>
    %45 = vector.broadcast %44 : vector<8x1xf32> to vector<8x8xf32>
    %46 = arith.mulf %43, %45 : vector<8x8xf32>
    %c0_30 = arith.constant 0 : index
    %c0_31 = arith.constant 0 : index
    %c8_32 = arith.constant 8 : index
    %47 = vector.load %arg9[%c0_30, %c0_31, %c8_32] : memref<1x8x32xf32, #tpu.memory_space<vmem>>, vector<1x8x8xf32>
    %48 = vector.shape_cast %47 : vector<1x8x8xf32> to vector<8x8xf32>
    %49 = vector.shape_cast %46 : vector<8x8xf32> to vector<1x8x8xf32>
    tpu.vector_store %arg9[%c0_30, %c0_31, %c8_32], %49 {strides = array<i32>} : memref<1x8x32xf32, #tpu.memory_space<vmem>>, vector<1x8x8xf32>,
    %c0_33 = arith.constant 0 : index
    %c16 = arith.constant 16 : index
    %50 = vector.load %arg10[%c0_33, %c16] : memref<8x32xf32, #tpu.memory_space<vmem>>, vector<8x8xf32>
    %c16_34 = arith.constant 16 : index
    %c0_35 = arith.constant 0 : index
    %51 = vector.load %arg11[%c16_34, %c0_35] : memref<32x8xf32, #tpu.memory_space<vmem>>, vector<8x8xf32>
    %c0_36 = arith.constant 0 : index
    %c16_37 = arith.constant 16 : index
    %52 = vector.load %arg12[%c0_36, %c16_37] : memref<8x32xf32, #tpu.memory_space<vmem>>, vector<8x8xf32>
    %cst_38 = arith.constant dense<0.000000e+00> : vector<8x8xf32>
    %53 = tpu.matmul %50, %51, %cst_38 {dimension_numbers = #tpu.dot_dimension_numbers<[1], [0], [0], [1], [0, 0, 1, 1], [], []>} : vector<8x8xf32>, vector<8x8xf32>, vector<8x8xf32> -> vector<8x8xf32>
    %cst_39 = arith.constant dense<0xFF800000> : vector<8xf32>
    %54 = vector.multi_reduction <maximumf>, %53, %cst_39 [1] : vector<8x8xf32> to vector<8xf32>
    %55 = vector.shape_cast %54 : vector<8xf32> to vector<8x1xf32>
    %56 = vector.broadcast %55 : vector<8x1xf32> to vector<8x8xf32>
    %57 = arith.subf %53, %56 : vector<8x8xf32>
    %58 = math.exp %57 : vector<8x8xf32>
    %cst_40 = arith.constant dense<0.000000e+00> : vector<8xf32>
    %59 = vector.multi_reduction <add>, %58, %cst_40 [1] : vector<8x8xf32> to vector<8xf32>
    %60 = vector.shape_cast %59 : vector<8xf32> to vector<8x1xf32>
    %cst_41 = arith.constant dense<0.000000e+00> : vector<8x8xf32>
    %61 = tpu.matmul %58, %52, %cst_41 {dimension_numbers = #tpu.dot_dimension_numbers<[1], [0], [0], [1], [0, 0, 1, 1], [], []>} : vector<8x8xf32>, vector<8x8xf32>, vector<8x8xf32> -> vector<8x8xf32>
    %62 = tpu.reciprocal %60 {approx = true} : vector<8x1xf32> -> vector<8x1xf32>
    %63 = vector.broadcast %62 : vector<8x1xf32> to vector<8x8xf32>
    %64 = arith.mulf %61, %63 : vector<8x8xf32>
    %c0_42 = arith.constant 0 : index
    %c0_43 = arith.constant 0 : index
    %c16_44 = arith.constant 16 : index
    %65 = vector.load %arg9[%c0_42, %c0_43, %c16_44] : memref<1x8x32xf32, #tpu.memory_space<vmem>>, vector<1x8x8xf32>
    %66 = vector.shape_cast %65 : vector<1x8x8xf32> to vector<8x8xf32>
    %67 = vector.shape_cast %64 : vector<8x8xf32> to vector<1x8x8xf32>
    tpu.vector_store %arg9[%c0_42, %c0_43, %c16_44], %67 {strides = array<i32>} : memref<1x8x32xf32, #tpu.memory_space<vmem>>, vector<1x8x8xf32>,
    %c0_45 = arith.constant 0 : index
    %c24 = arith.constant 24 : index
    %68 = vector.load %arg10[%c0_45, %c24] : memref<8x32xf32, #tpu.memory_space<vmem>>, vector<8x8xf32>
    %c24_46 = arith.constant 24 : index
    %c0_47 = arith.constant 0 : index
    %69 = vector.load %arg11[%c24_46, %c0_47] : memref<32x8xf32, #tpu.memory_space<vmem>>, vector<8x8xf32>
    %c0_48 = arith.constant 0 : index
    %c24_49 = arith.constant 24 : index
    %70 = vector.load %arg12[%c0_48, %c24_49] : memref<8x32xf32, #tpu.memory_space<vmem>>, vector<8x8xf32>
    %cst_50 = arith.constant dense<0.000000e+00> : vector<8x8xf32>
    %71 = tpu.matmul %68, %69, %cst_50 {dimension_numbers = #tpu.dot_dimension_numbers<[1], [0], [0], [1], [0, 0, 1, 1], [], []>} : vector<8x8xf32>, vector<8x8xf32>, vector<8x8xf32> -> vector<8x8xf32>
    %cst_51 = arith.constant dense<0xFF800000> : vector<8xf32>
    %72 = vector.multi_reduction <maximumf>, %71, %cst_51 [1] : vector<8x8xf32> to vector<8xf32>
    %73 = vector.shape_cast %72 : vector<8xf32> to vector<8x1xf32>
    %74 = vector.broadcast %73 : vector<8x1xf32> to vector<8x8xf32>
    %75 = arith.subf %71, %74 : vector<8x8xf32>
    %76 = math.exp %75 : vector<8x8xf32>
    %cst_52 = arith.constant dense<0.000000e+00> : vector<8xf32>
    %77 = vector.multi_reduction <add>, %76, %cst_52 [1] : vector<8x8xf32> to vector<8xf32>
    %78 = vector.shape_cast %77 : vector<8xf32> to vector<8x1xf32>
    %cst_53 = arith.constant dense<0.000000e+00> : vector<8x8xf32>
    %79 = tpu.matmul %76, %70, %cst_53 {dimension_numbers = #tpu.dot_dimension_numbers<[1], [0], [0], [1], [0, 0, 1, 1], [], []>} : vector<8x8xf32>, vector<8x8xf32>, vector<8x8xf32> -> vector<8x8xf32>
    %80 = tpu.reciprocal %78 {approx = true} : vector<8x1xf32> -> vector<8x1xf32>
    %81 = vector.broadcast %80 : vector<8x1xf32> to vector<8x8xf32>
    %82 = arith.mulf %79, %81 : vector<8x8xf32>
    %c0_54 = arith.constant 0 : index
    %c0_55 = arith.constant 0 : index
    %c24_56 = arith.constant 24 : index
    %83 = vector.load %arg9[%c0_54, %c0_55, %c24_56] : memref<1x8x32xf32, #tpu.memory_space<vmem>>, vector<1x8x8xf32>
    %84 = vector.shape_cast %83 : vector<1x8x8xf32> to vector<8x8xf32>
    %85 = vector.shape_cast %82 : vector<8x8xf32> to vector<1x8x8xf32>
    tpu.vector_store %arg9[%c0_54, %c0_55, %c24_56], %85 {strides = array<i32>} : memref<1x8x32xf32, #tpu.memory_space<vmem>>, vector<1x8x8xf32>,
    return
  }
  func.func @transform_0(%arg0: i32, %arg1: i32) -> (i32, i32, i32) {
    %c0_i32 = arith.constant 0 : i32
    %c0_i32_0 = arith.constant 0 : i32
    %c0_i32_1 = arith.constant 0 : i32
    return %arg0, %c0_i32, %c0_i32_0 : i32, i32, i32
  }
  func.func @transform_1(%arg0: i32, %arg1: i32) -> (i32, i32) {
    %c0_i32 = arith.constant 0 : i32
    %c0_i32_0 = arith.constant 0 : i32
    %c0_i32_1 = arith.constant 0 : i32
    return %c0_i32, %c0_i32_0 : i32, i32
  }
  func.func @transform_2(%arg0: i32, %arg1: i32) -> (i32, i32) {
    %c0_i32 = arith.constant 0 : i32
    %c0_i32_0 = arith.constant 0 : i32
    %c0_i32_1 = arith.constant 0 : i32
    return %c0_i32, %c0_i32_0 : i32, i32
  }
  func.func @transform_3(%arg0: i32, %arg1: i32) -> (i32, i32) {
    %c0_i32 = arith.constant 0 : i32
    %c0_i32_0 = arith.constant 0 : i32
    %c0_i32_1 = arith.constant 0 : i32
    return %c0_i32, %c0_i32_0 : i32, i32
  }
  func.func @transform_4(%arg0: i32, %arg1: i32) -> (i32, i32) {
    %c0_i32 = arith.constant 0 : i32
    %c0_i32_0 = arith.constant 0 : i32
    %c0_i32_1 = arith.constant 0 : i32
    return %c0_i32, %c0_i32_0 : i32, i32
  }
  func.func @transform_5(%arg0: i32, %arg1: i32) -> (i32, i32) {
    %c0_i32 = arith.constant 0 : i32
    %c0_i32_0 = arith.constant 0 : i32
    %c0_i32_1 = arith.constant 0 : i32
    return %c0_i32, %c0_i32_0 : i32, i32
  }
  func.func @transform_6(%arg0: i32, %arg1: i32) -> (i32, i32) {
    %c0_i32 = arith.constant 0 : i32
    %c0_i32_0 = arith.constant 0 : i32
    %c0_i32_1 = arith.constant 0 : i32
    return %c0_i32, %c0_i32_0 : i32, i32
  }
  func.func @transform_7(%arg0: i32, %arg1: i32) -> (i32, i32, i32) {
    %c0_i32 = arith.constant 0 : i32
    %c0_i32_0 = arith.constant 0 : i32
    return %arg0, %arg1, %c0_i32 : i32, i32, i32
  }
}

</mosaic_0001>

<bundles_post_ra>
// kernel: tpu_custom_call.1
= control target key start
LH: loop header
LB: loop body
LE: loop exit
PB: predicated region body
PF: predicated region fallthrough
CT: control target
= control target key end

     0   :  { %12 = vsyncpa [#allocation6], 0  ;;  %s2286_s0 = inlined_call_operand.hbm [shape: f32[2,8,32], index: 0, kind: input, shape index: {}]   ;;  %s2287_s1 = inlined_call_operand.vmem [shape: f32[32,32], index: 1, kind: input, shape index: {}]   ;;  %s2288_s2 = inlined_call_operand.hbm [shape: f32[32,32], index: 2, kind: input, shape index: {}]   ;;  %s2289_s3 = inlined_call_operand.hbm [shape: f32[32,32], index: 3, kind: input, shape index: {}]   ;;  %s2290_s4 = inlined_call_operand.vmem [shape: f32[1,32], index: 4, kind: input, shape index: {}]   ;;  %s2291_s5 = inlined_call_operand.vmem [shape: f32[32,1], index: 5, kind: input, shape index: {}]   ;;  %s2292_s6 = inlined_call_operand.vmem [shape: f32[1,32], index: 6, kind: input, shape index: {}]   ;;  %s2293_s7 = inlined_call_operand.hbm [shape: f32[2,8,32], index: 7, kind: output, shape index: {}]  }
   0x1   :  { %14 = vsyncpa [#allocation6 + $0x1], 0 }
   0x2   :  { %15 = vsyncpa [#allocation9], 0 }
   0x3   :  { %16 = vsyncpa [#allocation7], 0 }
   0x4   :  { %18 = vsyncpa [#allocation7 + $0x1], 0  ;;  %s1930_s24 = smov 0   ;;  %s1932_s25 = smov 0  }
   0x5   :  { %s1934_s26 = smov 0   ;;  %s1936_s27 = smov 0  }
   0x6   :  { %s1938_s28 = smov 0   ;;  %s1940_s29 = smov 0  }
   0x7 LB: > { %2300 = sst [smem:[#allocation15_spill]] %s1852_s24  ;;  %s1440_s30 = sadd.s32 4294967295, %s1872_s29   ;;  %s1872_s29 = sphi %s1940_s29, %s24_s29   ;;  %s1868_s28 = sphi %s1938_s28, %s2321_s28   ;;  %s1864_s27 = sphi %s1936_s27, %s2320_s27   ;;  %s1860_s26 = sphi %s1934_s26, %s2319_s26   ;;  %s1856_s25 = sphi %s1932_s25, %s2318_s25   ;;  %s1852_s24 = sphi %s1930_s24, %s2317_s24  }
   0x8   : > { %s1441_s8 = sadd.s32 4294967294, %s1872_s29   ;;  %p56_p0 = scmp.ne.s32.totalorder %s1856_s25, %s1852_s24 }
   0x9   : > { %p1964_p1 = scmp.eq.s32.totalorder %s1440_s30, 0  ;;  %p1968_p2 = scmp.eq.s32.totalorder %s1440_s30, 1 }
   0xa   : > { %p214_p3 = scmp.eq.s32.totalorder %s1441_s8, 1  ;;  %p1442_p5 = scmp.ge.s32.totalorder %s1872_s29, 1 }
   0xb   : > { %s2301_s9 = scalar_select %p1964_p1, 1, 0 }
   0xc   : > { %p1974_p4 = por %p1964_p1, %p56_p0  ;;  %p1979_p6 = por %p214_p3, %p56_p0 }
   0xd   : > { %p221_p7 = scmp.lt.s32.totalorder %s1872_s29, 3  ;;  %s1874_s14 = smov [#allocation8]  }
   0xe   : > { %s2303_s11 = scalar_select %p1974_p4, 1, 0 }
   0xf   : > { %s2304_s12 = scalar_select %p1979_p6, 1, 0 }
  0x10   : > { %p1984_p8 = pnand %p1442_p5, %p221_p7  ;;  %s236_s15 = sshll.u32 %s1874_s14, 4  ;;  %s1988_s15 = int_to_ptr.vmem [resolvable:$true] %s236_s15 }
  0x11   : > { %2305 = sst [smem:[#allocation16_spill]] %s2304_s12  ;;  %s1875_s17 = smov [#allocation10]  }
  0x12   : > { %p1599_p9 = pneg %p1984_p8  ;;  %s249_s18 = sshll.u32 %s1875_s17, 4  ;;  %s1999_s18 = int_to_ptr.vmem [resolvable:$true] %s249_s18 }
  0x13   : > { %s1700_s21 = scalar_lea.hbm %s2288_s2, 512 }
  0x14   : > { %p1995_p11 = pnand %p1599_p9, %p1964_p1  ;;  %p1701_p12 = scmp.ne.s32.totalorder %s2288_s2, %s1700_s21 }
  0x15   : > { %p1707_p5 = scmp.lt.u32.totalorder %s1700_s21, %s2288_s2 }
  0x16   : > { %p1702_p13 = pneg %p1995_p11 }
  0x18   : > { %p1703_p0 = pnand %p1702_p13, %p1701_p12 }
  0x1a   : > { %p1704_p3 = pneg %p1703_p0 }
  0x1c   : > { %p1709_p7 = pnand %p1707_p5, %p1704_p3 }
  0x1e   : > { %1712 = shalt.err (!%p1709_p7)
}
  0x1f   : > { %s1713_s14 = scalar_lea.vmem %s1988_s15, 512  ;;  %p1721_p1 = scmp.lt.s32.totalorder %s1988_s15, %s1988_s15 }
  0x20   : > { %p1714_p9 = scmp.ne.s32.totalorder %s1988_s15, %s1713_s14  ;;  %p1722_p12 = scmp.lt.s32.totalorder %s1713_s14, %s1713_s14 }
  0x22   : > { %p1716_p10 = pnand %p1714_p9, %p1702_p13  ;;  %p1723_p0 = por %p1722_p12, %p1721_p1 }
  0x24   : > { %p1717_p6 = pneg %p1716_p10 }
  0x26   : > { %p1724_p4 = pnand %p1723_p0, %p1717_p6 }
  0x28   : > { %1727 = shalt.err (!%p1724_p4)
}
  0x29   : > { %s1876_s17 = smov 128   ;;  %s1877_s19 = smov 8  }
  0x2a   : > { %1602 = dma.hbm_to_vmem [thread:$0]  (!%p1995_p11), %s2288_s2, 512, %s1988_s15, [#allocation9], %s1876_s17, %s1876_s17, %s1877_s19  }
  0x2b   : > { %s1728_s30 = scalar_lea.hbm %s2289_s3, 512 }
  0x2c   : > { %p1729_p1 = scmp.ne.s32.totalorder %s2289_s3, %s1728_s30  ;;  %p1735_p10 = scmp.lt.u32.totalorder %s1728_s30, %s2289_s3 }
  0x2e   : > { %p1731_p4 = pnand %p1729_p1, %p1702_p13 }
  0x30   : > { %p1732_p6 = pneg %p1731_p4 }
  0x32   : > { %p1737_p3 = pnand %p1735_p10, %p1732_p6 }
  0x34   : > { %1740 = shalt.err (!%p1737_p3)
}
  0x35   : > { %s1741_s15 = scalar_lea.vmem %s1999_s18, 512  ;;  %p1749_p12 = scmp.lt.s32.totalorder %s1999_s18, %s1999_s18 }
  0x36   : > { %p1742_p5 = scmp.ne.s32.totalorder %s1999_s18, %s1741_s15  ;;  %p1750_p0 = scmp.lt.s32.totalorder %s1741_s15, %s1741_s15 }
  0x38   : > { %p1744_p7 = pnand %p1742_p5, %p1702_p13  ;;  %p1751_p1 = por %p1750_p0, %p1749_p12 }
  0x3a   : > { %p1745_p9 = pneg %p1744_p7 }
  0x3c   : > { %p1752_p4 = pnand %p1751_p1, %p1745_p9 }
  0x3e   : > { %1755 = shalt.err (!%p1752_p4)
}
  0x3f   : > { %1605 = dma.hbm_to_vmem [thread:$0]  (!%p1995_p11), %s2289_s3, 512, %s1999_s18, [#allocation9], %s1876_s17, %s1876_s17, %s1877_s19  }
  0x40   : > { %s36_s20 = sadd.s32 1, %s1868_s28  ;;  %s43_s21 = sadd.s32 1, %s1860_s26 }
  0x41   : > { %p38_p13 = scmp.ge.s32.totalorder %s36_s20, 2  ;;  %p50_p6 = scmp.ne.s32.totalorder %s1860_s26, %s1856_s25 }
  0x42   : > { %p51_p10 = scmp.eq.s32.totalorder %s1872_s29, 0  ;;  %p1616_p3 = scmp.lt.s32.totalorder %s1872_s29, 2 }
  0x43   : > { %s2323_s20 = smov (%p38_p13, %s36_s20), 0  ;;  %p2063_p7 = por %p1968_p2, %p50_p6 }
  0x44   : > { %p52_p5 = por %p51_p10, %p50_p6  ;;  %s40_s22 = ssub.s32 %s1868_s28, %s2323_s20 }
  0x45   : > { %s2308_s16 = scalar_select %p2063_p7, 1, 0 }
  0x46   : > { %s272_s23 = sand.u32 1, %s1860_s26   ;;  %p41_p9 = scmp.eq.s32.totalorder %s40_s22, 0 }
  0x47   : > { %s1446_s18 = sshll.u32 %s272_s23, 3  ;;  %s1447_s17 = sshll.u32 %s1868_s28, 7 }
  0x48   : > { %s2072_s19 = scalar_select %p41_p9, %s1860_s26, %s43_s21  }
  0x49   : > { %s2077_s14 = scalar_lea.hbm %s2286_s0, %s1447_s17  ;;  %s276_s10 = scalar_lea.vmem [#allocation5], %s1446_s18 }
  0x4a   : > { %s283_s15 = sshll.u32 %s276_s10, 4  ;;  %p2081_p2 = pnand %p1616_p3, %p52_p5  ;;  %s2085_s15 = int_to_ptr.vmem [resolvable:$true] %s283_s15 }
  0x4b   : > { %s273_s12 = scalar_lea.sflag [#allocation6], %s272_s23  ;;  %s1756_s21 = scalar_lea.hbm %s2077_s14, 128 }
  0x4c   : > { %p1757_p11 = scmp.ne.s32.totalorder %s2077_s14, %s1756_s21  ;;  %p1758_p12 = pneg %p2081_p2 }
  0x4d   : > { %s1761_s17 = scalar_lea.hbm %s2286_s0, 256  ;;  %p1762_p4 = scmp.lt.u32.totalorder %s2077_s14, %s2286_s0 }
  0x4e   : > { %p1759_p0 = pnand %p1758_p12, %p1757_p11  ;;  %p1763_p13 = scmp.lt.u32.totalorder %s1761_s17, %s1756_s21 }
  0x4f   : > { %p1765_p10 = scmp.lt.u32.totalorder %s1756_s21, %s2077_s14 }
  0x50   : > { %p1760_p1 = pneg %p1759_p0  ;;  %p1764_p6 = por %p1763_p13, %p1762_p4 }
  0x52   : > { %p1766_p3 = por %p1765_p10, %p1764_p6 }
  0x54   : > { %p1767_p5 = pnand %p1766_p3, %p1760_p1 }
  0x56   : > { %1770 = shalt.err (!%p1767_p5)
}
  0x57   : > { %s1771_s23 = scalar_lea.vmem %s2085_s15, 128  ;;  %s1878_s10 = smov [#allocation5]  }
  0x58   : > { %p1772_p9 = scmp.ne.s32.totalorder %s2085_s15, %s1771_s23  ;;  %s1776_s22 = sshll.u32 %s1878_s10, 4  ;;  %s1777_s22 = int_to_ptr.vmem [resolvable:$false] %s1776_s22 }
  0x59   : > { %s1778_s18 = scalar_lea.vmem %s1777_s22, 256  ;;  %p1779_p7 = scmp.lt.s32.totalorder %s2085_s15, %s1777_s22 }
  0x5a   : > { %p1774_p11 = pnand %p1772_p9, %p1758_p12  ;;  %p1780_p4 = scmp.lt.s32.totalorder %s1778_s18, %s1771_s23 }
  0x5c   : > { %p1775_p0 = pneg %p1774_p11  ;;  %p1781_p13 = por %p1780_p4, %p1779_p7 }
  0x5e   : > { %p1782_p6 = pnand %p1781_p13, %p1775_p0 }
  0x60   : > { %1785 = shalt.err (!%p1782_p6)
}
  0x61   : > { %1609 = dma.hbm_to_vmem [thread:$0]  (!%p2081_p2), %s2077_s14, 128, %s2085_s15, %s273_s12  }
  0x62   : > { %292 = sbr.rel (%p1984_p8) target bundleno = 1182 (0x49e), region = 48  ;;  %s2115_s21 = sand.u32 (!%p1984_p8), 1, %s1856_s25  }
  0x63   : > { %s1449_s17 = sshll.u32 (!%p1984_p8), %s2115_s21, 3  ;;  %s295_s30 = scalar_lea.sflag (!%p1984_p8), [#allocation6], %s2115_s21 }
  0x64   : > { %s298_s8 = scalar_lea.vmem (!%p1984_p8), [#allocation5], %s1449_s17  ;;  %p2310_p7 = scmp.ne.s32.totalorder (!%p1984_p8), %s2303_s11, 0 }
  0x69   : > { %1839 = dma.done.wait (%p2310_p7), %s295_s30, 128  }
  0x6a   : > { %1841 = vsyncadd (%p2310_p7), %s295_s30, 4294967168  ;;  %p2311_p2 = scmp.ne.s32.totalorder %s2301_s9, 0 }
  0x6c   : > { %1843 = dma.done.wait (%p2311_p2), [#allocation9], 1024  }
  0x6d   : > { %1845 = vsyncadd (%p2311_p2), [#allocation9], 4294966272  ;;  %v1879_v0 = vmov 0.0|0.0   ;;  %vm1880_vm0 = vmmov 0   ;;  %v1881_v1 = vmov 0.0   ;;  %v1882_v2 = vmov 0  }
  0x6e   : > { %1575 = vmatprep.subr.bf16.mxu1 %v1879_v0  ;;  %1521 = vmatprep.mubr.msk.f32.mxu1 %vm1880_vm0, %v1881_v1  ;;  %vm370_vm1 = vcmask 261120   ;;  %v341_v3 = vld [vmem:[%s298_s8] sm:$0xff]  ;;  %v342_v4 = vld [vmem:[#allocation8] sm:$0xff]  ;;  %v562_v6 = vld [vmem:[%s2287_s1 + $0x8] sm:$0xff]  ;;  %vm471_vm2 = vcmask 64512   ;;  %s1883_s24 = smov 120  }
  0x6f   : > { %1682 = vset.pattern.permute.xlu0 %v1882_v2  ;;  %1683 = vset.pattern.permute.xlu1 %v1882_v2  ;;  %v561_v5 = vld [vmem:[%s2287_s1] sm:$0xff]  ;;  %v343_v7 = vld [vmem:[#allocation8 + $0x8] sm:$0xff]  ;;  %v344_v9 = vld [vmem:[#allocation8 + $0x10] sm:$0xff]  ;;  %s1884_s12 = smov 112   ;;  %s1885_s23 = smov 104   ;;  %vm979_vm3 = vcmask 130112  }
  0x70   : > { %1505 = vmatprep.subr.msk.mxu0 %vm370_vm1, %v341_v3  ;;  %1507 = vmatprep.mubr.msk.f32.mxu0 %vm370_vm1, %v342_v4  ;;  %v1582_v8 = vpack.c.bf16 %v562_v6, %v561_v5  ;;  %v563_v10 = vld [vmem:[%s2287_s1 + $0x10] sm:$0xff]  ;;  %v564_v11 = vld [vmem:[%s2287_s1 + $0x18] sm:$0xff]  ;;  %v346_v12 = vld [vmem:[%s2291_s5] sm:$0xff]  ;;  %s2225_s18 = scalar_lea.vmem [#allocation11], %s1449_s17  ;;  %s1886_s30 = smov 8   ;;  %vm1151_vm4 = vcmask 195712  }
  0x71   : > { %1506 = vmatpush3.xpose.msk.msra.mxu0 %vm370_vm1, %v341_v3  ;;  %v348_v13 = vld [vmem:[%s2291_s5 + $0x10] sm:$0xff]  ;;  %352 = vperm.xlu0 %1682, %v346_v12   ;;  %v347_v14 = vld [vmem:[%s2291_s5 + $0x8] sm:$0xff]  ;;  %v349_v15 = vld [vmem:[%s2291_s5 + $0x18] sm:$0xff]  ;;  %v1585_v17 = vpack.c.bf16 %v564_v11, %v563_v10  ;;  %s1887_s17 = smov 16   ;;  %s1888_s8 = smov 24   ;;  %vm1323_vm5 = vcmask 261312  }
  0x72   : > { %1581 = vmatprep.subr.bf16.mxu0 %v1879_v0  ;;  %362 = vperm.xlu1 %1683, %v348_v13   ;;  %v345_v16 = vld [vmem:[#allocation8 + $0x18] sm:$0xff]  ;;  %v476_v18 = vld [vmem:[#allocation10] sm:$0xff]  ;;  %v477_v19 = vld [vmem:[#allocation10 + $0x8] sm:$0xff]  ;;  %s1471_s11 = sshll.u32 %s1864_s27, 7  ;;  %s1340_s9 = sshll.u32 %s2225_s18, 4  ;;  %s2238_s9 = int_to_ptr.vmem [resolvable:$true] %s1340_s9 }
  0x73   : > { %v1576_v20 = vpack.c.bf16 %v477_v19, %v476_v18  ;;  %v478_v21 = vld [vmem:[#allocation10 + $0x10] sm:$0xff]  ;;  %v479_v22 = vld [vmem:[#allocation10 + $0x18] sm:$0xff]  ;;  %v1460_v36 = vld [vmem:[%s2290_s4] ss:$0 sm:$0xff]  ;;  %s2236_s15 = scalar_lea.hbm %s2293_s7, %s1471_s11  ;;  %p2312_p12 = scmp.ne.s32.totalorder %s2308_s16, 0 }
  0x74   : > { %1508 = vmatmul.mubr.msk.f32.vlgmr.msra.gmra.mrb[0].mxu0 %vm370_vm1, %v343_v7  ;;  %v1579_v23 = vpack.c.bf16 %v479_v22, %v478_v21  ;;  %v1458_v43 = vld [vmem:[%s2292_s6] ss:$0 sm:$0xff]  ;;  %s1889_s27 = smov [#allocation11]  }
  0x75   : > { %1583 = vmatpush3.bf16.msra.mxu0 %v1582_v8  ;;  %1510 = vmatprep.mubr.msk.f32.mxu0 %vm370_vm1, %v344_v9 }
  0x76   : > { %1584 = vmatprep.subr.bf16.mxu0 %v1879_v0  ;;  %357 = vperm.xlu0 %1682, %v347_v14  }
  0x77   : > { %367 = vperm.xlu1 %1683, %v349_v15   ;;  %1577 = vmatpush3.bf16.msra.mxu1 %v1576_v20 }
  0x78   : > { %1511 = vmatmul.mubr.msk.f32.gmra.mrb[2].mxu0 %vm370_vm1, %v345_v16  ;;  %1578 = vmatprep.subr.bf16.mxu1 %v1879_v0 }
  0x79   : > { %1586 = vmatpush3.bf16.msra.mxu0 %v1585_v17  ;;  %1532 = vmatprep.mubr.msk.f32.mxu0 %vm1880_vm0, %v1881_v1 }
  0x7a   : > { %1540 = vmatprep.subr.mxu0 %v1881_v1 }
  0x7b   : > { %1580 = vmatpush3.bf16.msra.mxu1 %v1579_v23 }
  0x7c   : > { %1533 = vmatmul.mubr.msk.f32.vlgmr.msra.gmra.mrb[4].mxu0 %vm370_vm1, %v341_v3  ;;  %1535 = vmatprep.subr.mxu1 %v1881_v1 }
  0x7d   : > { %1542 = vmatprep.mubr.msk.f32.mxu0 %vm1880_vm0, %v1881_v1 }
  0x7e   : > { %1522 = vmatmul.mubr.msk.f32.vlgmr.msra.gmra.mrb[0].mxu1 %vm370_vm1, %v341_v3 }
  0x7f   : > { %1537 = vmatprep.mubr.msk.f32.mxu1 %vm1880_vm0, %v1881_v1 }
  0xf0   : > { %v353_v24 = vpop.permute.xlu0 %352 }
  0xf1   : > { %v363_v25 = vpop.permute.xlu1 %362 }
  0xf5   : > { %v358_v26 = vpop.permute.xlu0 %357 }
  0xf6   : > { %v368_v31 = vpop.permute.xlu1 %367 }
 0x147   : > { %v1509_v27 = vpop.f32.mrb[0].mxu0 }
 0x148   : > { %v458_v28 = vadd.f32 %v1509_v27, %v358_v26  ;;  %v452_v29 = vpop.f32.mrb[1].mxu0 }
 0x149   : > { %v453_v30 = vadd.f32 %v452_v29, %v353_v24 }
 0x14a   : > { %473 = vst.msk [vmem:[#allocation3 + $0x8] sm:$0xff] %vm471_vm2, %v458_v28 }
 0x14b   : > { %472 = vst.msk [vmem:[#allocation3] sm:$0xff] %vm471_vm2, %v453_v30  ;;  %v1512_v32 = vpop.f32.mrb[2].mxu0 }
 0x14c   : > { %v468_v33 = vadd.f32 %v1512_v32, %v368_v31  ;;  %v462_v34 = vpop.f32.mrb[3].mxu0 }
 0x14d   : > { %v463_v35 = vadd.f32 %v462_v34, %v363_v25 }
 0x14e   : > { %475 = vst.msk [vmem:[#allocation3 + $0x18] sm:$0xff] %vm471_vm2, %v468_v33 }
 0x14f   : > { %474 = vst.msk [vmem:[#allocation3 + $0x10] sm:$0xff] %vm471_vm2, %v463_v35  ;;  %v642_v37 = vpop.f32.mrb[4].mxu0 }
 0x150   : > { %v643_v38 = vadd.f32 %v1460_v36, %v642_v37  ;;  %v1534_v39 = vpop.f32.mrb[5].mxu0 }
 0x151   : > { %v810_v42 = vld [vmem:[#allocation3 + $0x8] sm:$0xff]  ;;  %v553_v44 = vpop.f32.mrb[0].mxu1 }
 0x152   : > { %646 = vst.msk [vmem:[#allocation2] sm:$0xff] %vm370_vm1, %v643_v38  ;;  %v648_v40 = vld [vmem:[#allocation3] sm:$0xff]  ;;  %v554_v45 = vadd.f32 %v1458_v43, %v553_v44  ;;  %v1523_v46 = vpop.f32.mrb[1].mxu1 }
 0x153   : > { %1536 = vmatpush3.msra.mxu1 %v648_v40 }
 0x154   : > { %1545 = vmatprep.subr.mxu1 %v1881_v1  ;;  %557 = vst.msk [vmem:[#allocation4] sm:$0xff] %vm370_vm1, %v554_v45 }
 0x155   : > { %v1154_v51 = vld [vmem:[#allocation3 + $0x18] sm:$0xff] }
 0x156   : > { %v982_v49 = vld [vmem:[#allocation3 + $0x10] sm:$0xff] }
 0x159   : > { %v809_v41 = vld [vmem:[#allocation2] sm:$0xff] }
 0x15a   : > { %813 = vrot.lane.b32.xlu0 %v809_v41, %s1883_s24  ;;  %1538 = vmatmul.mubr.msk.f32.vlgmr.msra.gmra.mrb[2].mxu1 %vm471_vm2, %v809_v41 }
 0x15b   : > { %1546 = vmatpush3.msra.mxu1 %v810_v42  ;;  %985 = vrot.lane.b32.xlu1 %v809_v41, %s1884_s12  ;;  %v649_v47 = vld [vmem:[#allocation4] sm:$0xff] }
 0x15c   : > { %1547 = vmatprep.mubr.msk.f32.mxu1 %vm1880_vm0, %v1881_v1  ;;  %1555 = vmatprep.subr.mxu1 %v1881_v1 }
 0x15d   : > { %1541 = vmatpush3.msra.mxu0 %v649_v47 }
 0x15e   : > { %1157 = vrot.lane.b32.xlu0 %v809_v41, %s1885_s23  ;;  %1550 = vmatprep.subr.mxu0 %v1881_v1 }
 0x1cc   : > { %v814_v48 = vpop.permute.xlu0 %813 }
 0x1cd   : > { %1548 = vmatmul.mubr.msk.f32.vlgmr.msra.gmra.mrb[4].mxu1 %vm471_vm2, %v814_v48  ;;  %v986_v50 = vpop.permute.xlu1 %985 }
 0x1ce   : > { %1556 = vmatpush3.msra.mxu1 %v982_v49  ;;  %1557 = vmatprep.mubr.msk.f32.mxu1 %vm1880_vm0, %v1881_v1 }
 0x1cf   : > { %1565 = vmatprep.subr.mxu1 %v1881_v1 }
 0x1d0   : > { %v1158_v52 = vpop.permute.xlu0 %1157 }
 0x1d1   : > { %1558 = vmatmul.mubr.msk.f32.vlgmr.msra.gmra.mrb[6].mxu1 %vm471_vm2, %v986_v50 }
 0x1d2   : > { %1566 = vmatpush3.msra.mxu1 %v1154_v51  ;;  %1567 = vmatprep.mubr.msk.f32.mxu1 %vm1880_vm0, %v1881_v1 }
 0x1d5   : > { %1568 = vmatmul.mubr.msk.f32.vlgmr.msra.gmra.mrb[8].mxu1 %vm471_vm2, %v1158_v52 }
 0x22d   : > { %v720_v53 = vpop.f32.mrb[2].mxu1 }
 0x22e   : > { %v1539_v54 = vpop.f32.mrb[3].mxu1  ;;  %v724_v55 = vsel %vm471_vm2, %v720_v53, -inf }
 0x22f   : > { %725 = vmax.xlane.f32.xlu1 %v724_v55 }
 0x240   : > { %1069 = vrot.lane.b32.xlu1 %v649_v47, %s1884_s12  ;;  %s1786_s12 = scalar_lea.vmem %s2238_s9, 128 }
 0x241   : > { %p1787_p8 = scmp.ne.s32.totalorder %s2238_s9, %s1786_s12 }
 0x243   : > { %p1788_p1 = pnand %p1787_p8, %p2312_p12 }
 0x245   : > { %p1789_p10 = pneg %p1788_p1 }
 0x2a0   : > { %v883_v56 = vpop.f32.mrb[4].mxu1 }
 0x2a1   : > { %v1549_v57 = vpop.f32.mrb[5].mxu1  ;;  %v887_v58 = vsel %vm471_vm2, %v883_v56, -inf }
 0x2a2   : > { %888 = vmax.xlane.f32.xlu0 %v887_v58 }
 0x2a4   : > { %v1055_v59 = vpop.f32.mrb[6].mxu1 }
 0x2a5   : > { %v1559_v60 = vpop.f32.mrb[7].mxu1  ;;  %v1059_v61 = vsel %vm471_vm2, %v1055_v59, -inf }
 0x2a6   : > { %1060 = vmax.xlane.f32.xlu0 %v1059_v61 }
 0x2a8   : > { %v1227_v62 = vpop.f32.mrb[8].mxu1 }
 0x2a9   : > { %v1569_v63 = vpop.f32.mrb[9].mxu1  ;;  %v1231_v0 = vsel %vm471_vm2, %v1227_v62, -inf }
 0x2aa   : > { %1232 = vmax.xlane.f32.xlu1 %v1231_v0 }
 0x2bb   : > { %1241 = vrot.lane.b32.xlu1 %v649_v47, %s1885_s23  ;;  %s1790_s23 = sshll.u32 %s1889_s27, 4  ;;  %s1791_s23 = int_to_ptr.vmem [resolvable:$false] %s1790_s23 }
 0x2bc   : > { %v726_v2 = vpop.xlane.xlu1 %725  ;;  %897 = vrot.lane.b32.xlu0 %v649_v47, %s1883_s24  ;;  %s1326_s24 = scalar_lea.sflag [#allocation7], %s2115_s21  ;;  %s1792_s10 = scalar_lea.vmem %s1791_s23, 256 }
 0x2bd   : > { %v727_v3 = vsub.f32 %v720_v53, %v726_v2  ;;  %p1793_p3 = scmp.lt.s32.totalorder %s2238_s9, %s1791_s23  ;;  %p1794_p5 = scmp.lt.s32.totalorder %s1792_s10, %s1786_s12 }
 0x2bf   : > { %v728_v4 = vmul.f32 1.442695, %v727_v3  ;;  %p1795_p9 = por %p1794_p5, %p1793_p3 }
 0x2c0   : > { %v1070_v9 = vpop.permute.xlu1 %1069 }
 0x2c1   : > { %1684 = vpow2.f32 %v728_v4  ;;  %p1796_p11 = pnand %p1795_p9, %p1789_p10 }
 0x2cb   : > { %v1685_v5 = vpop.eup %1684 }
 0x2cc   : > { %1543 = vmatmul.mubr.msk.f32.vlgmr.msra.gmra.mrb[6].mxu0 %vm471_vm2, %v1685_v5  ;;  %v730_v24 = vsel %vm471_vm2, %v1685_v5, 0.0 }
 0x2cd   : > { %1552 = vmatprep.mubr.msk.f32.mxu0 %vm1880_vm0, %v1881_v1 }
 0x32f   : > { %v889_v6 = vpop.xlane.xlu0 %888 }
 0x330   : > { %v890_v7 = vsub.f32 %v883_v56, %v889_v6 }
 0x332   : > { %v891_v8 = vmul.f32 1.442695, %v890_v7 }
 0x333   : > { %v1061_v10 = vpop.xlane.xlu0 %1060 }
 0x334   : > { %1686 = vpow2.f32 %v891_v8  ;;  %v1062_v11 = vsub.f32 %v1055_v59, %v1061_v10 }
 0x336   : > { %v1063_v12 = vmul.f32 1.442695, %v1062_v11 }
 0x337   : > { %v898_v13 = vpop.permute.xlu0 %897  ;;  %v1233_v14 = vpop.xlane.xlu1 %1232 }
 0x338   : > { %1688 = vpow2.f32 %v1063_v12  ;;  %v1234_v15 = vsub.f32 %v1227_v62, %v1233_v14  ;;  %1551 = vmatpush3.msra.mxu0 %v898_v13 }
 0x339   : > { %1560 = vmatprep.subr.mxu0 %v1881_v1 }
 0x33a   : > { %v1235_v16 = vmul.f32 1.442695, %v1234_v15 }
 0x33b   : > { %v1242_v20 = vpop.permute.xlu1 %1241 }
 0x33c   : > { %1690 = vpow2.f32 %v1235_v16 }
 0x33e   : > { %v1687_v17 = vpop.eup %1686 }
 0x33f   : > { %1553 = vmatmul.mubr.msk.f32.vlgmr.msra.gmra.mrb[8].mxu0 %vm471_vm2, %v1687_v17  ;;  %v893_v18 = vsel %vm471_vm2, %v1687_v17, 0.0 }
 0x340   : > { %1561 = vmatpush3.msra.mxu0 %v1070_v9  ;;  %894 = vadd.xlane.f32.xlu0 %v893_v18 }
 0x341   : > { %1562 = vmatprep.mubr.msk.f32.mxu0 %vm1880_vm0, %v1881_v1  ;;  %1570 = vmatprep.subr.mxu0 %v1881_v1 }
 0x342   : > { %v1689_v19 = vpop.eup %1688 }
 0x343   : > { %1563 = vmatmul.mubr.msk.f32.vlgmr.msra.gmra.mrb[10].mxu0 %vm471_vm2, %v1689_v19  ;;  %v1065_v21 = vsel %vm471_vm2, %v1689_v19, 0.0 }
 0x344   : > { %1571 = vmatpush3.msra.mxu0 %v1242_v20  ;;  %1066 = vadd.xlane.f32.xlu1 %v1065_v21 }
 0x345   : > { %1572 = vmatprep.mubr.msk.f32.mxu0 %vm1880_vm0, %v1881_v1 }
 0x346   : > { %v1691_v22 = vpop.eup %1690 }
 0x347   : > { %1573 = vmatmul.mubr.msk.f32.vlgmr.msra.gmra.mrb[12].mxu0 %vm471_vm2, %v1691_v22  ;;  %v1237_v23 = vsel %vm471_vm2, %v1691_v22, 0.0 }
 0x348   : > { %1238 = vadd.xlane.f32.xlu0 %v1237_v23 }
 0x34c   : > { %731 = vadd.xlane.f32.xlu0 %v730_v24 }
 0x39f   : > { %v802_v25 = vpop.f32.mrb[6].mxu0 }
 0x3a0   : > { %v1544_v26 = vpop.f32.mrb[7].mxu0 }
 0x3cd   : > { %v895_v27 = vpop.xlane.xlu0 %894 }
 0x3d1   : > { %v1067_v1 = vpop.xlane.xlu1 %1066 }
 0x3d5   : > { %v1239_v28 = vpop.xlane.xlu0 %1238 }
 0x3d9   : > { %v732_v29 = vpop.xlane.xlu0 %731 }
 0x3da   : > { %1692 = vrcp.f32 %v732_v29 }
 0x3db   : > { %1694 = vrcp.f32 %v895_v27 }
 0x3dc   : > { %1696 = vrcp.f32 %v1067_v1 }
 0x3dd   : > { %1698 = vrcp.f32 %v1239_v28 }
 0x3e4   : > { %v1693_v30 = vpop.eup %1692 }
 0x3e5   : > { %v807_v31 = vmul.f32 %v1693_v30, %v802_v25  ;;  %v1695_v32 = vpop.eup %1694 }
 0x3e6   : > { %v1697_v36 = vpop.eup %1696 }
 0x3e7   : > { %808 = vst.msk [vmem:[%s2225_s18] sm:$0xff] %vm471_vm2, %v807_v31  ;;  %v1699_v40 = vpop.eup %1698 }
 0x412   : > { %v969_v33 = vpop.f32.mrb[8].mxu0 }
 0x413   : > { %v974_v34 = vmul.f32 %v1695_v32, %v969_v33  ;;  %v1554_v35 = vpop.f32.mrb[9].mxu0 }
 0x415   : > { %976 = vrot.lane.b32.xlu1 %v974_v34, %s1886_s30 }
 0x416   : > { %v1141_v37 = vpop.f32.mrb[10].mxu0 }
 0x417   : > { %v1146_v38 = vmul.f32 %v1697_v36, %v1141_v37  ;;  %v1564_v39 = vpop.f32.mrb[11].mxu0 }
 0x419   : > { %1148 = vrot.lane.b32.xlu0 %v1146_v38, %s1887_s17 }
 0x41a   : > { %v1313_v41 = vpop.f32.mrb[12].mxu0 }
 0x41b   : > { %v1318_v42 = vmul.f32 %v1699_v40, %v1313_v41  ;;  %v1574_v43 = vpop.f32.mrb[13].mxu0 }
 0x41d   : > { %1320 = vrot.lane.b32.xlu1 %v1318_v42, %s1888_s8 }
 0x487   : > { %v977_v44 = vpop.permute.xlu1 %976 }
 0x488   : > { %980 = vst.msk [vmem:[%s2225_s18] sm:$0xff] %vm979_vm3, %v977_v44 }
 0x48b   : > { %v1149_v45 = vpop.permute.xlu0 %1148 }
 0x48c   : > { %1152 = vst.msk [vmem:[%s2225_s18] sm:$0xff] %vm1151_vm4, %v1149_v45 }
 0x48f   : > { %v1321_v46 = vpop.permute.xlu1 %1320 }
 0x490   : > { %1324 = vst.msk [vmem:[%s2225_s18] sm:$0xff] %vm1323_vm5, %v1321_v46 }
 0x491   : > { %1799 = shalt.err (!%p1796_p11)
}
 0x492   : > { %s1800_s21 = scalar_lea.hbm %s2236_s15, 128  ;;  %s1804_s30 = scalar_lea.hbm %s2293_s7, 256 }
 0x493   : > { %p1801_p0 = scmp.ne.s32.totalorder %s2236_s15, %s1800_s21  ;;  %p1805_p6 = scmp.lt.u32.totalorder %s2236_s15, %s2293_s7 }
 0x494   : > { %p1806_p7 = scmp.lt.u32.totalorder %s1804_s30, %s1800_s21  ;;  %p1808_p8 = scmp.lt.u32.totalorder %s1800_s21, %s2236_s15 }
 0x495   : > { %p1802_p4 = pnand %p1801_p0, %p2312_p12 }
 0x496   : > { %p1807_p2 = por %p1806_p7, %p1805_p6 }
 0x497   : > { %p1803_p13 = pneg %p1802_p4 }
 0x498   : > { %p1809_p1 = por %p1808_p8, %p1807_p2 }
 0x49a   : > { %p1810_p10 = pnand %p1809_p1, %p1803_p13 }
 0x49c   : > { %1813 = shalt.err (!%p1810_p10)
}
 0x49d   : > { %1597 = dma.vmem_to_hbm [thread:$0]  (%p2312_p12), %s2238_s9, 128, %s2236_s15, %s1326_s24  }
 0x49e PF: > { %s2313_s11 = sld [smem:[#allocation15_spill]]  ;;  %s2314_s13 = sld [smem:[#allocation16_spill]] }
 0x49f   : > { %p2316_p5 = scmp.ge.s32.totalorder %s1872_s29, 2 }
 0x4a4   : > { %s1352_s14 = sand.u32 1, %s2313_s11   ;;  %p2315_p3 = scmp.ne.s32.totalorder %s2314_s13, 0 }
 0x4a5   : > { %s1353_s12 = scalar_lea.sflag [#allocation7], %s1352_s14 }
 0x4a6   : > { %p1611_p9 = pnand %p2316_p5, %p2315_p3 }
 0x4a8   : > { %1847 = dma.done.wait (!%p1611_p9), %s1353_s12, 128  }
 0x4a9   : > { %1849 = vsyncadd (!%p1611_p9), %s1353_s12, 4294967168  ;;  %s24_s29 = sadd.s32 1, %s1872_s29   ;;  %s2317_s24 = smov %s1856_s25 }
 0x4aa   : > { %p21_p11 = scmp.ge.s32.totalorder %s24_s29, 4   ;;  %s2318_s25 = smov %s1860_s26 }
 0x4ab   : > { %s2319_s26 = smov %s2072_s19  ;;  %s2320_s27 = smov %s1868_s28 }
 0x4ac   : > { %s2321_s28 = smov %s2323_s20  ;;  %23 = sbr.rel (!%p21_p11) target bundleno = 7 (0x7), region = 106 }
 0x4b3   :  { %1358 = vsyncpa [#allocation6], 1 }
 0x4b4   :  { %1360 = vsyncpa [#allocation6 + $0x1], 1 }
 0x4b5   :  { %1361 = vsyncpa [#allocation9], 1 }
 0x4b6   :  { %1362 = vsyncpa [#allocation7], 1 }
 0x4b7   :  { %1364 = vsyncpa [#allocation7 + $0x1], 1 }

</bundles_post_ra>
